<compile_context>
chip_gen: v5e
topology: v5e:2x2
jax: 0.10.0
libtpu: 0.0.40
codegen_flags: <defaults>
</compile_context>

<pallas_src>
import jax
import jax.numpy as jnp
from jax.experimental import pallas as pl
from jax.experimental.pallas import tpu as pltpu

HIDDEN = 256  # fixed by the module definition


def _round_up(x, m):
    return (x + m - 1) // m * m


def _mlp_kernel(x_ref, w1_ref, b1_ref, w2_ref, b2_ref, o_ref):
    # In-kernel cast of x to the compute dtype (no wrapper-side pad/cast pass).
    x = x_ref[...].astype(w1_ref.dtype)
    # First linear on the MXU with f32 accumulation; bias + ReLU ride on the VPU.
    h = jnp.dot(x, w1_ref[...], preferred_element_type=jnp.float32)
    h = jnp.maximum(h + b1_ref[...], 0.0)
    # TODO(synk): Dropout is identity at inference; training-mode dropout would
    # need pltpu.prng_seed / prng_random_bits masking + 1/(1-p) rescale here.
    y = jnp.dot(h.astype(w2_ref.dtype), w2_ref[...],
                preferred_element_type=jnp.float32)
    o_ref[...] = (y + b2_ref[...]).astype(o_ref.dtype)


def prepare_params(w1, b1, w2, b2, *, compute_dtype=jnp.bfloat16):
    """One-time weight prep (cast + bias reshape) -- hoisted out of the call path.

    w1: (in_features, 256), b1: (256,), w2: (256, out_features), b2: (out_features,)
    """
    K, H = w1.shape
    H2, N = w2.shape
    assert H == HIDDEN and H2 == HIDDEN
    assert b1.shape == (HIDDEN,) and b2.shape == (N,)
    return (w1.astype(compute_dtype),
            b1.astype(jnp.float32).reshape(1, HIDDEN),
            w2.astype(compute_dtype),
            b2.astype(jnp.float32).reshape(1, N))


def _choose_tb(batch, block_batch):
    """Row-tile size: multiple of 8, >=2 grid steps when possible, low ragged waste."""
    b8 = _round_up(batch, 8)
    tb = min(block_batch, b8)
    if b8 >= 16 and pl.cdiv(batch, tb) < 2:
        # Split the batch so both TensorCores (megacore / v7x) get work and the
        # x-tile DMA pipelines against compute.
        tb = _round_up(pl.cdiv(b8, 2), 8)
    if tb >= batch:
        # Single whole-batch block: block dim == full array dim is always legal,
        # even when batch is not a multiple of 8.
        tb = batch
    return tb


def fixed_deep_processor(x, params, *, out_dtype=None, block_batch=512):
    """x: (B, in_features); params from prepare_params(). Returns (B, out_features)."""
    w1p, b1p, w2p, b2p = params
    B, K = x.shape
    Kw, H = w1p.shape
    H2, N = w2p.shape
    assert Kw == K and H == HIDDEN and H2 == HIDDEN
    assert b1p.shape == (1, HIDDEN) and b2p.shape == (1, N)

    if out_dtype is None:
        out_dtype = x.dtype

    TB = _choose_tb(B, block_batch)
    grid = (pl.cdiv(B, TB),)

    # VMEM working-set estimate: single-buffered resident weights/biases,
    # double-buffered x/out tiles, the f32 hidden intermediate and the f32
    # matmul result before the epilogue cast.
    c_it = jnp.dtype(w1p.dtype).itemsize
    x_it = jnp.dtype(x.dtype).itemsize
    o_it = jnp.dtype(out_dtype).itemsize
    est = ((K * HIDDEN + HIDDEN * N) * c_it     # resident weights
           + (HIDDEN + N) * 4                   # resident biases (f32)
           + 2 * TB * K * x_it                  # double-buffered x tiles
           + 2 * TB * N * o_it                  # double-buffered out tiles
           + TB * HIDDEN * 4                    # f32 hidden intermediate
           + TB * max(HIDDEN, N) * 4)           # f32 result before epilogue cast
    # Headroom for Mosaic internal scratch; never clamp at v7x's full 64 MiB.
    vmem_limit = int(min(max(2 * est + (4 << 20), 32 << 20), 48 << 20))

    def launch(single_buffer_weights):
        wkw = ({"pipeline_mode": pl.Buffered(buffer_count=1)}
               if single_buffer_weights else {})
        return pl.pallas_call(
            _mlp_kernel,
            out_shape=jax.ShapeDtypeStruct((B, N), out_dtype),
            grid=grid,
            in_specs=[
                pl.BlockSpec((TB, K), lambda i: (i, 0)),             # x (pipelined)
                pl.BlockSpec((K, HIDDEN), lambda i: (0, 0), **wkw),  # w1 (resident)
                pl.BlockSpec((1, HIDDEN), lambda i: (0, 0), **wkw),  # b1 (resident)
                pl.BlockSpec((HIDDEN, N), lambda i: (0, 0), **wkw),  # w2 (resident)
                pl.BlockSpec((1, N), lambda i: (0, 0), **wkw),       # b2 (resident)
            ],
            out_specs=pl.BlockSpec((TB, N), lambda i: (i, 0)),
            compiler_params=pltpu.CompilerParams(
                dimension_semantics=("parallel",),
                vmem_limit_bytes=vmem_limit,
            ),
        )(x, w1p, b1p, w2p, b2p)

    try:
        return launch(True)
    except Exception:
        # Fallback for jaxlib versions that reject Buffered(1) on a pallas_call
        # BlockSpec; default double-buffering is correctness-identical.
        return launch(False)


def init_params(key, in_features, out_features, dtype=jnp.float32):
    """Deterministic synthetic init mimicking nn.Linear's uniform(-1/sqrt(fan_in), ...)."""
    k1, k2, k3, k4 = jax.random.split(key, 4)
    bound1 = 1.0 / jnp.sqrt(jnp.asarray(in_features, dtype))
    bound2 = 1.0 / jnp.sqrt(jnp.asarray(HIDDEN, dtype))
    # Stored as (in, out) == PyTorch weight.T
    w1 = jax.random.uniform(k1, (in_features, HIDDEN), dtype, -bound1, bound1)
    b1 = jax.random.uniform(k2, (HIDDEN,), dtype, -bound1, bound1)
    w2 = jax.random.uniform(k3, (HIDDEN, out_features), dtype, -bound2, bound2)
    b2 = jax.random.uniform(k4, (out_features,), dtype, -bound2, bound2)
    return w1, b1, w2, b2


if __name__ == "__main__":
    batch = 8
    in_features = 32
    out_features = 64

    key = jax.random.PRNGKey(0)
    kx, kp, kx2 = jax.random.split(key, 3)
    x = jax.random.normal(kx, (batch, in_features), jnp.float32)
    w1, b1, w2, b2 = init_params(kp, in_features, out_features)

    # Reference in plain JAX (eval-mode dropout == identity).
    ref = jnp.maximum(x @ w1 + b1, 0.0) @ w2 + b2

    # 1) f32 compute path: tight check.
    p_f32 = prepare_params(w1, b1, w2, b2, compute_dtype=jnp.float32)
    out_f32 = jax.block_until_ready(fixed_deep_processor(x, p_f32))
    assert out_f32.shape == (batch, out_features)
    assert jnp.allclose(out_f32, ref, atol=2e-3, rtol=2e-3)

    # 2) bf16 compute path (default fast path), f32 output: loose check.
    p_bf16 = prepare_params(w1, b1, w2, b2)
    out_bf16 = jax.block_until_ready(fixed_deep_processor(x, p_bf16))
    assert out_bf16.shape == (batch, out_features)
    assert jnp.allclose(out_bf16, ref, atol=5e-2, rtol=5e-2)

    # 3) bf16 output dtype (halves the writeback DMA stream).
    out_b16o = jax.block_until_ready(
        fixed_deep_processor(x, p_bf16, out_dtype=jnp.bfloat16))
    assert out_b16o.dtype == jnp.bfloat16
    assert jnp.allclose(out_b16o.astype(jnp.float32), ref, atol=8e-2, rtol=8e-2)

    # 4) Ragged batch (B not a multiple of the row tile): exercises the cdiv
    #    grid with a partial last block and >= 2 "parallel" grid steps.
    x2 = jax.random.normal(kx2, (12, in_features), jnp.float32)
    ref2 = jnp.maximum(x2 @ w1 + b1, 0.0) @ w2 + b2
    out2 = jax.block_until_ready(fixed_deep_processor(x2, p_f32))
    assert out2.shape == (12, out_features)
    assert jnp.allclose(out2, ref2, atol=2e-3, rtol=2e-3)

    print("KERNEL_OK")
</pallas_src>

<mosaic_0001>
module attributes {stable_mosaic.version = 11 : i64} {
  func.func @_mlp_kernel(%arg0: i32, %arg1: memref<8x32xf32, #tpu.memory_space<vmem>>, %arg2: memref<32x256xf32, #tpu.memory_space<vmem>>, %arg3: memref<1x256xf32, #tpu.memory_space<vmem>>, %arg4: memref<256x64xf32, #tpu.memory_space<vmem>>, %arg5: memref<1x64xf32, #tpu.memory_space<vmem>>, %arg6: memref<8x64xf32, #tpu.memory_space<vmem>>) attributes {dimension_semantics = [#tpu.dimension_semantics<parallel>], iteration_bounds = array<i64: 1>, scalar_prefetch = 0 : i64, scratch_operands = 0 : i64, tpu.core_type = #tpu.core_type<tc>, window_params = [{transform_indices = @transform_0, window_bounds = array<i64: 8, 32>}, {pipeline_mode = #tpu.pipeline_mode<synchronous>, transform_indices = @transform_1, window_bounds = array<i64: 32, 256>}, {pipeline_mode = #tpu.pipeline_mode<synchronous>, transform_indices = @transform_2, window_bounds = array<i64: 1, 256>}, {pipeline_mode = #tpu.pipeline_mode<synchronous>, transform_indices = @transform_3, window_bounds = array<i64: 256, 64>}, {pipeline_mode = #tpu.pipeline_mode<synchronous>, transform_indices = @transform_4, window_bounds = array<i64: 1, 64>}, {transform_indices = @transform_5, window_bounds = array<i64: 8, 64>}]} {
    %c0 = arith.constant 0 : index
    %c0_0 = arith.constant 0 : index
    %0 = vector.load %arg1[%c0, %c0_0] : memref<8x32xf32, #tpu.memory_space<vmem>>, vector<8x32xf32>
    %c0_1 = arith.constant 0 : index
    %c0_2 = arith.constant 0 : index
    %1 = vector.load %arg2[%c0_1, %c0_2] : memref<32x256xf32, #tpu.memory_space<vmem>>, vector<32x256xf32>
    %cst = arith.constant dense<0.000000e+00> : vector<8x256xf32>
    %2 = tpu.matmul %0, %1, %cst {dimension_numbers = #tpu.dot_dimension_numbers<[1], [0], [0], [1], [0, 0, 1, 1], [], []>} : vector<8x32xf32>, vector<32x256xf32>, vector<8x256xf32> -> vector<8x256xf32>
    %c0_3 = arith.constant 0 : index
    %c0_4 = arith.constant 0 : index
    %3 = vector.load %arg3[%c0_3, %c0_4] : memref<1x256xf32, #tpu.memory_space<vmem>>, vector<1x256xf32>
    %4 = vector.broadcast %3 : vector<1x256xf32> to vector<8x256xf32>
    %5 = arith.addf %2, %4 : vector<8x256xf32>
    %cst_5 = arith.constant 0.000000e+00 : f32
    %6 = vector.broadcast %cst_5 : f32 to vector<8x256xf32>
    %7 = arith.maximumf %5, %6 : vector<8x256xf32>
    %c0_6 = arith.constant 0 : index
    %c0_7 = arith.constant 0 : index
    %8 = vector.load %arg4[%c0_6, %c0_7] : memref<256x64xf32, #tpu.memory_space<vmem>>, vector<256x64xf32>
    %cst_8 = arith.constant dense<0.000000e+00> : vector<8x64xf32>
    %9 = tpu.matmul %7, %8, %cst_8 {dimension_numbers = #tpu.dot_dimension_numbers<[1], [0], [0], [1], [0, 0, 1, 1], [], []>} : vector<8x256xf32>, vector<256x64xf32>, vector<8x64xf32> -> vector<8x64xf32>
    %c0_9 = arith.constant 0 : index
    %c0_10 = arith.constant 0 : index
    %10 = vector.load %arg5[%c0_9, %c0_10] : memref<1x64xf32, #tpu.memory_space<vmem>>, vector<1x64xf32>
    %11 = vector.broadcast %10 : vector<1x64xf32> to vector<8x64xf32>
    %12 = arith.addf %9, %11 : vector<8x64xf32>
    %c0_11 = arith.constant 0 : index
    %c0_12 = arith.constant 0 : index
    %13 = vector.load %arg6[%c0_11, %c0_12] : memref<8x64xf32, #tpu.memory_space<vmem>>, vector<8x64xf32>
    tpu.vector_store %arg6[%c0_11, %c0_12], %12 {strides = array<i32>} : memref<8x64xf32, #tpu.memory_space<vmem>>, vector<8x64xf32>,
    return
  }
  func.func @transform_0(%arg0: i32) -> (i32, i32) {
    %c0_i32 = arith.constant 0 : i32
    %c0_i32_0 = arith.constant 0 : i32
    return %arg0, %c0_i32 : i32, i32
  }
  func.func @transform_1(%arg0: i32) -> (i32, i32) {
    %c0_i32 = arith.constant 0 : i32
    %c0_i32_0 = arith.constant 0 : i32
    %c0_i32_1 = arith.constant 0 : i32
    return %c0_i32, %c0_i32_0 : i32, i32
  }
  func.func @transform_2(%arg0: i32) -> (i32, i32) {
    %c0_i32 = arith.constant 0 : i32
    %c0_i32_0 = arith.constant 0 : i32
    %c0_i32_1 = arith.constant 0 : i32
    return %c0_i32, %c0_i32_0 : i32, i32
  }
  func.func @transform_3(%arg0: i32) -> (i32, i32) {
    %c0_i32 = arith.constant 0 : i32
    %c0_i32_0 = arith.constant 0 : i32
    %c0_i32_1 = arith.constant 0 : i32
    return %c0_i32, %c0_i32_0 : i32, i32
  }
  func.func @transform_4(%arg0: i32) -> (i32, i32) {
    %c0_i32 = arith.constant 0 : i32
    %c0_i32_0 = arith.constant 0 : i32
    %c0_i32_1 = arith.constant 0 : i32
    return %c0_i32, %c0_i32_0 : i32, i32
  }
  func.func @transform_5(%arg0: i32) -> (i32, i32) {
    %c0_i32 = arith.constant 0 : i32
    %c0_i32_0 = arith.constant 0 : i32
    return %arg0, %c0_i32 : i32, i32
  }
}

module attributes {stable_mosaic.version = 11 : i64} {
  func.func @_mlp_kernel(%arg0: i32, %arg1: memref<8x32xf32, #tpu.memory_space<vmem>>, %arg2: memref<32x256xf32, #tpu.memory_space<vmem>>, %arg3: memref<1x256xf32, #tpu.memory_space<vmem>>, %arg4: memref<256x64xf32, #tpu.memory_space<vmem>>, %arg5: memref<1x64xf32, #tpu.memory_space<vmem>>, %arg6: memref<8x64xf32, #tpu.memory_space<vmem>>) attributes {dimension_semantics = [#tpu.dimension_semantics<parallel>], iteration_bounds = array<i64: 1>, scalar_prefetch = 0 : i64, scratch_operands = 0 : i64, tpu.core_type = #tpu.core_type<tc>, window_params = [{transform_indices = @transform_0, window_bounds = array<i64: 8, 32>}, {pipeline_mode = #tpu.pipeline_mode<synchronous>, transform_indices = @transform_1, window_bounds = array<i64: 32, 256>}, {pipeline_mode = #tpu.pipeline_mode<synchronous>, transform_indices = @transform_2, window_bounds = array<i64: 1, 256>}, {pipeline_mode = #tpu.pipeline_mode<synchronous>, transform_indices = @transform_3, window_bounds = array<i64: 256, 64>}, {pipeline_mode = #tpu.pipeline_mode<synchronous>, transform_indices = @transform_4, window_bounds = array<i64: 1, 64>}, {transform_indices = @transform_5, window_bounds = array<i64: 8, 64>}]} {
    %c0 = arith.constant 0 : index
    %c0_0 = arith.constant 0 : index
    %0 = vector.load %arg1[%c0, %c0_0] : memref<8x32xf32, #tpu.memory_space<vmem>>, vector<8x32xf32>
    %c0_1 = arith.constant 0 : index
    %c0_2 = arith.constant 0 : index
    %1 = vector.load %arg2[%c0_1, %c0_2] : memref<32x256xf32, #tpu.memory_space<vmem>>, vector<32x256xf32>
    %cst = arith.constant dense<0.000000e+00> : vector<8x256xf32>
    %2 = tpu.matmul %0, %1, %cst {dimension_numbers = #tpu.dot_dimension_numbers<[1], [0], [0], [1], [0, 0, 1, 1], [], []>} : vector<8x32xf32>, vector<32x256xf32>, vector<8x256xf32> -> vector<8x256xf32>
    %c0_3 = arith.constant 0 : index
    %c0_4 = arith.constant 0 : index
    %3 = vector.load %arg3[%c0_3, %c0_4] : memref<1x256xf32, #tpu.memory_space<vmem>>, vector<1x256xf32>
    %4 = vector.broadcast %3 : vector<1x256xf32> to vector<8x256xf32>
    %5 = arith.addf %2, %4 : vector<8x256xf32>
    %cst_5 = arith.constant 0.000000e+00 : f32
    %6 = vector.broadcast %cst_5 : f32 to vector<8x256xf32>
    %7 = arith.maximumf %5, %6 : vector<8x256xf32>
    %c0_6 = arith.constant 0 : index
    %c0_7 = arith.constant 0 : index
    %8 = vector.load %arg4[%c0_6, %c0_7] : memref<256x64xf32, #tpu.memory_space<vmem>>, vector<256x64xf32>
    %cst_8 = arith.constant dense<0.000000e+00> : vector<8x64xf32>
    %9 = tpu.matmul %7, %8, %cst_8 {dimension_numbers = #tpu.dot_dimension_numbers<[1], [0], [0], [1], [0, 0, 1, 1], [], []>} : vector<8x256xf32>, vector<256x64xf32>, vector<8x64xf32> -> vector<8x64xf32>
    %c0_9 = arith.constant 0 : index
    %c0_10 = arith.constant 0 : index
    %10 = vector.load %arg5[%c0_9, %c0_10] : memref<1x64xf32, #tpu.memory_space<vmem>>, vector<1x64xf32>
    %11 = vector.broadcast %10 : vector<1x64xf32> to vector<8x64xf32>
    %12 = arith.addf %9, %11 : vector<8x64xf32>
    %c0_11 = arith.constant 0 : index
    %c0_12 = arith.constant 0 : index
    %13 = vector.load %arg6[%c0_11, %c0_12] : memref<8x64xf32, #tpu.memory_space<vmem>>, vector<8x64xf32>
    tpu.vector_store %arg6[%c0_11, %c0_12], %12 {strides = array<i32>} : memref<8x64xf32, #tpu.memory_space<vmem>>, vector<8x64xf32>,
    return
  }
  func.func @transform_0(%arg0: i32) -> (i32, i32) {
    %c0_i32 = arith.constant 0 : i32
    %c0_i32_0 = arith.constant 0 : i32
    return %arg0, %c0_i32 : i32, i32
  }
  func.func @transform_1(%arg0: i32) -> (i32, i32) {
    %c0_i32 = arith.constant 0 : i32
    %c0_i32_0 = arith.constant 0 : i32
    %c0_i32_1 = arith.constant 0 : i32
    return %c0_i32, %c0_i32_0 : i32, i32
  }
  func.func @transform_2(%arg0: i32) -> (i32, i32) {
    %c0_i32 = arith.constant 0 : i32
    %c0_i32_0 = arith.constant 0 : i32
    %c0_i32_1 = arith.constant 0 : i32
    return %c0_i32, %c0_i32_0 : i32, i32
  }
  func.func @transform_3(%arg0: i32) -> (i32, i32) {
    %c0_i32 = arith.constant 0 : i32
    %c0_i32_0 = arith.constant 0 : i32
    %c0_i32_1 = arith.constant 0 : i32
    return %c0_i32, %c0_i32_0 : i32, i32
  }
  func.func @transform_4(%arg0: i32) -> (i32, i32) {
    %c0_i32 = arith.constant 0 : i32
    %c0_i32_0 = arith.constant 0 : i32
    %c0_i32_1 = arith.constant 0 : i32
    return %c0_i32, %c0_i32_0 : i32, i32
  }
  func.func @transform_5(%arg0: i32) -> (i32, i32) {
    %c0_i32 = arith.constant 0 : i32
    %c0_i32_0 = arith.constant 0 : i32
    return %arg0, %c0_i32 : i32, i32
  }
}

</mosaic_0001>

<bundles_post_ra>
// kernel: tpu_custom_call.1
= control target key start
LH: loop header
LB: loop body
LE: loop exit
PB: predicated region body
PF: predicated region fallthrough
CT: control target
= control target key end

     0   :  { %vm36_vm0 = vcmask 261120   ;;  %s369_s0 = inlined_call_operand.vmem [shape: f32[8,32], index: 0, kind: input, shape index: {}]   ;;  %s370_s1 = inlined_call_operand.vmem [shape: f32[32,256], index: 1, kind: input, shape index: {}]   ;;  %s371_s2 = inlined_call_operand.vmem [shape: f32[1,256], index: 2, kind: input, shape index: {}]   ;;  %s372_s3 = inlined_call_operand.vmem [shape: f32[256,64], index: 3, kind: input, shape index: {}]   ;;  %s373_s4 = inlined_call_operand.vmem [shape: f32[1,64], index: 4, kind: input, shape index: {}]   ;;  %s374_s5 = inlined_call_operand.hbm [shape: f32[8,64], index: 5, kind: output, shape index: {}]  }
   0x1   :  { %v28_v0 = vld [vmem:[%s370_s1 + $0x30] sm:$0xff]  ;;  %v26_v1 = vld [vmem:[%s370_s1 + $0x20] sm:$0xff]  ;;  %v29_v2 = vld [vmem:[%s370_s1 + $0x38] sm:$0xff] }
   0x2   :  { %52 = vmatpush.msra.mxu0 %v28_v0  ;;  %72 = vmatpush.msra.mxu1 %v29_v2  ;;  %v27_v3 = vld [vmem:[%s370_s1 + $0x28] sm:$0xff]  ;;  %v24_v4 = vld [vmem:[%s370_s1 + $0x10] sm:$0xff]  ;;  %v25_v5 = vld [vmem:[%s370_s1 + $0x18] sm:$0xff] }
   0x3   :  { %v97_v6 = vld [vmem:[%s372_s3 + $0x78] sm:$0xff]  ;;  %v96_v7 = vld [vmem:[%s372_s3 + $0x70] sm:$0xff]  ;;  %v22_v9 = vld [vmem:[%s370_s1] sm:$0xff] }
   0x4   :  { %53 = vmatpush.msra.mxu0 %v26_v1  ;;  %73 = vmatpush.msra.mxu1 %v27_v3  ;;  %v113_v8 = vld [vmem:[%s372_s3 + $0xf8] sm:$0xff]  ;;  %v23_v10 = vld [vmem:[%s370_s1 + $0x8] sm:$0xff]  ;;  %v112_v11 = vld [vmem:[%s372_s3 + $0xf0] sm:$0xff] }
   0x5   :  { %118 = vmatpush.msra.mxu2 %v97_v6  ;;  %138 = vmatpush.msra.mxu3 %v113_v8  ;;  %v21_v12 = vld [vmem:[%s369_s0] sm:$0xff]  ;;  %v95_v13 = vld [vmem:[%s372_s3 + $0x68] sm:$0xff]  ;;  %v93_v17 = vld [vmem:[%s372_s3 + $0x58] sm:$0xff] }
   0x6   :  { %54 = vmatpush.msra.mxu0 %v24_v4  ;;  %74 = vmatpush.msra.mxu1 %v25_v5  ;;  %v111_v14 = vld [vmem:[%s372_s3 + $0xe8] sm:$0xff]  ;;  %v94_v15 = vld [vmem:[%s372_s3 + $0x60] sm:$0xff]  ;;  %v109_v18 = vld [vmem:[%s372_s3 + $0xd8] sm:$0xff] }
   0x7   :  { %119 = vmatpush.msra.mxu2 %v96_v7  ;;  %139 = vmatpush.msra.mxu3 %v112_v11  ;;  %v110_v16 = vld [vmem:[%s372_s3 + $0xe0] sm:$0xff]  ;;  %v92_v19 = vld [vmem:[%s372_s3 + $0x50] sm:$0xff] }
   0x8   :  { %55 = vmatpush.msra.mxu0 %v22_v9  ;;  %75 = vmatpush.msra.mxu1 %v23_v10  ;;  %v108_v20 = vld [vmem:[%s372_s3 + $0xd0] sm:$0xff] }
   0x9   :  { %176 = vmatmul.msk.f32.vlgmr.msra.gmra.mxu0 %vm36_vm0, %v21_v12  ;;  %177 = vmatmul.msk.f32.vlgmr.msra.gmra.mxu1 %vm36_vm0, %v21_v12 }
   0xa   :  { %120 = vmatpush.msra.mxu2 %v95_v13  ;;  %140 = vmatpush.msra.mxu3 %v111_v14 }
   0xc   :  { %121 = vmatpush.msra.mxu2 %v94_v15  ;;  %141 = vmatpush.msra.mxu3 %v110_v16 }
   0xd   :  { %10 = vsyncpa [#allocation3], 0  ;;  %v91_v21 = vld [vmem:[%s372_s3 + $0x48] sm:$0xff]  ;;  %v90_v23 = vld [vmem:[%s372_s3 + $0x40] sm:$0xff]  ;;  %s167_s25 = sshll.u32 %s374_s5, 4  ;;  %vm158_vm1 = vcmask 523264   ;;  %s168_s25 = int_to_ptr.hbm [resolvable:$true] %s167_s25 }
   0xe   :  { %122 = vmatpush.msra.mxu2 %v93_v17  ;;  %142 = vmatpush.msra.mxu3 %v109_v18  ;;  %v107_v22 = vld [vmem:[%s372_s3 + $0xc8] sm:$0xff]  ;;  %v106_v24 = vld [vmem:[%s372_s3 + $0xc0] sm:$0xff]  ;;  %v89_v25 = vld [vmem:[%s372_s3 + $0x38] sm:$0xff] }
   0xf   :  { %v105_v26 = vld [vmem:[%s372_s3 + $0xb8] sm:$0xff]  ;;  %v88_v27 = vld [vmem:[%s372_s3 + $0x30] sm:$0xff]  ;;  %v87_v29 = vld [vmem:[%s372_s3 + $0x28] sm:$0xff] }
  0x10   :  { %123 = vmatpush.msra.mxu2 %v92_v19  ;;  %143 = vmatpush.msra.mxu3 %v108_v20  ;;  %v104_v28 = vld [vmem:[%s372_s3 + $0xb0] sm:$0xff]  ;;  %v103_v30 = vld [vmem:[%s372_s3 + $0xa8] sm:$0xff]  ;;  %v86_v31 = vld [vmem:[%s372_s3 + $0x20] sm:$0xff] }
  0x11   :  { %v102_v32 = vld [vmem:[%s372_s3 + $0xa0] sm:$0xff]  ;;  %v85_v33 = vld [vmem:[%s372_s3 + $0x18] sm:$0xff]  ;;  %v84_v34 = vld [vmem:[%s372_s3 + $0x10] sm:$0xff] }
  0x12   :  { %124 = vmatpush.msra.mxu2 %v91_v21  ;;  %144 = vmatpush.msra.mxu3 %v107_v22  ;;  %v101_v35 = vld [vmem:[%s372_s3 + $0x98] sm:$0xff]  ;;  %v83_v36 = vld [vmem:[%s372_s3 + $0x8] sm:$0xff]  ;;  %v100_v37 = vld [vmem:[%s372_s3 + $0x90] sm:$0xff] }
  0x13   :  { %v82_v38 = vld [vmem:[%s372_s3] sm:$0xff]  ;;  %v99_v39 = vld [vmem:[%s372_s3 + $0x88] sm:$0xff] }
  0x14   :  { %125 = vmatpush.msra.mxu2 %v90_v23  ;;  %145 = vmatpush.msra.mxu3 %v106_v24  ;;  %v98_v40 = vld [vmem:[%s372_s3 + $0x80] sm:$0xff]  ;;  %s206_s3 = smov [#allocation2]  }
  0x15   :  { %v30_v41 = vld [vmem:[%s371_s2] sm:$0x3]  ;;  %s165_s0 = sshll.u32 %s206_s3, 4  ;;  %s166_s0 = int_to_ptr.vmem [resolvable:$true] %s165_s0 }
  0x16   :  { %126 = vmatpush.msra.mxu2 %v89_v25  ;;  %146 = vmatpush.msra.mxu3 %v105_v26  ;;  %v32_v42 = vperm.slane %v30_v41, 0  ;;  %v33_v43 = vperm.slane %v30_v41, 1  ;;  %v179_v50 = vld [vmem:[%s373_s4] ss:$0 sm:$0xff] }
  0x18   :  { %127 = vmatpush.msra.mxu2 %v88_v27  ;;  %147 = vmatpush.msra.mxu3 %v104_v28 }
  0x1a   :  { %128 = vmatpush.msra.mxu2 %v87_v29  ;;  %148 = vmatpush.msra.mxu3 %v103_v30 }
  0x1c   :  { %129 = vmatpush.msra.mxu2 %v86_v31  ;;  %149 = vmatpush.msra.mxu3 %v102_v32 }
  0x1e   :  { %130 = vmatpush.msra.mxu2 %v85_v33  ;;  %150 = vmatpush.msra.mxu3 %v101_v35 }
  0x20   :  { %131 = vmatpush.msra.mxu2 %v84_v34  ;;  %151 = vmatpush.msra.mxu3 %v100_v37 }
  0x22   :  { %132 = vmatpush.msra.mxu2 %v83_v36  ;;  %152 = vmatpush.msra.mxu3 %v99_v39 }
  0x24   :  { %133 = vmatpush.msra.mxu2 %v82_v38  ;;  %153 = vmatpush.msra.mxu3 %v98_v40 }
  0x86   :  { %v57_v44 = vpop.f32.mrf.mxu0  ;;  %v77_v45 = vpop.f32.mrf.mxu1 }
  0x87   :  { %v58_v46 = vadd.f32 %v57_v44, %v32_v42  ;;  %v78_v47 = vadd.f32 %v77_v45, %v33_v43 }
  0x89   :  { %v80_v48 = vmax.f32 %v58_v46, 0.0  ;;  %v81_v49 = vmax.f32 %v78_v47, 0.0 }
  0x8b   :  { %134 = vmatmul.f32.vlgmr.msra.gmra.mxu2 %v80_v48  ;;  %154 = vmatmul.f32.vlgmr.msra.gmra.mxu3 %v81_v49 }
 0x10e   :  { %v135_v51 = vpop.f32.mrf.mxu2  ;;  %v155_v52 = vpop.f32.mrf.mxu3 }
 0x10f   :  { %v136_v53 = vadd.f32 %v179_v50, %v135_v51 }
 0x111   :  { %v156_v54 = vadd.f32 %v155_v52, %v136_v53 }
 0x113   :  { %159 = vst.msk [vmem:[#allocation2] sm:$0xff] %vm158_vm1, %v156_v54 }
 0x114   :  { %170 = dma.vmem_to_hbm [thread:$0]  %s166_s0, 128, %s168_s25, [#allocation3]  }
 0x115   :  { %204 = dma.done.wait [#allocation3], 128  }
 0x116   :  { %205 = vsyncadd [#allocation3], 4294967168 }
 0x117   :  { %175 = vsyncpa [#allocation3], 1 }

// kernel: tpu_custom_call.1
= control target key start
LH: loop header
LB: loop body
LE: loop exit
PB: predicated region body
PF: predicated region fallthrough
CT: control target
= control target key end

     0   :  { %vm36_vm0 = vcmask 261120   ;;  %s369_s0 = inlined_call_operand.vmem [shape: f32[8,32], index: 0, kind: input, shape index: {}]   ;;  %s370_s1 = inlined_call_operand.vmem [shape: f32[32,256], index: 1, kind: input, shape index: {}]   ;;  %s371_s2 = inlined_call_operand.vmem [shape: f32[1,256], index: 2, kind: input, shape index: {}]   ;;  %s372_s3 = inlined_call_operand.vmem [shape: f32[256,64], index: 3, kind: input, shape index: {}]   ;;  %s373_s4 = inlined_call_operand.vmem [shape: f32[1,64], index: 4, kind: input, shape index: {}]   ;;  %s374_s5 = inlined_call_operand.hbm [shape: f32[8,64], index: 5, kind: output, shape index: {}]  }
   0x1   :  { %v28_v0 = vld [vmem:[%s370_s1 + $0x30] sm:$0xff]  ;;  %v26_v1 = vld [vmem:[%s370_s1 + $0x20] sm:$0xff]  ;;  %v29_v2 = vld [vmem:[%s370_s1 + $0x38] sm:$0xff] }
   0x2   :  { %52 = vmatpush.msra.mxu0 %v28_v0  ;;  %72 = vmatpush.msra.mxu1 %v29_v2  ;;  %v27_v3 = vld [vmem:[%s370_s1 + $0x28] sm:$0xff]  ;;  %v24_v4 = vld [vmem:[%s370_s1 + $0x10] sm:$0xff]  ;;  %v25_v5 = vld [vmem:[%s370_s1 + $0x18] sm:$0xff] }
   0x3   :  { %v97_v6 = vld [vmem:[%s372_s3 + $0x78] sm:$0xff]  ;;  %v96_v7 = vld [vmem:[%s372_s3 + $0x70] sm:$0xff]  ;;  %v22_v9 = vld [vmem:[%s370_s1] sm:$0xff] }
   0x4   :  { %53 = vmatpush.msra.mxu0 %v26_v1  ;;  %73 = vmatpush.msra.mxu1 %v27_v3  ;;  %v113_v8 = vld [vmem:[%s372_s3 + $0xf8] sm:$0xff]  ;;  %v23_v10 = vld [vmem:[%s370_s1 + $0x8] sm:$0xff]  ;;  %v112_v11 = vld [vmem:[%s372_s3 + $0xf0] sm:$0xff] }
   0x5   :  { %118 = vmatpush.msra.mxu2 %v97_v6  ;;  %138 = vmatpush.msra.mxu3 %v113_v8  ;;  %v21_v12 = vld [vmem:[%s369_s0] sm:$0xff]  ;;  %v95_v13 = vld [vmem:[%s372_s3 + $0x68] sm:$0xff]  ;;  %v93_v17 = vld [vmem:[%s372_s3 + $0x58] sm:$0xff] }
   0x6   :  { %54 = vmatpush.msra.mxu0 %v24_v4  ;;  %74 = vmatpush.msra.mxu1 %v25_v5  ;;  %v111_v14 = vld [vmem:[%s372_s3 + $0xe8] sm:$0xff]  ;;  %v94_v15 = vld [vmem:[%s372_s3 + $0x60] sm:$0xff]  ;;  %v109_v18 = vld [vmem:[%s372_s3 + $0xd8] sm:$0xff] }
   0x7   :  { %119 = vmatpush.msra.mxu2 %v96_v7  ;;  %139 = vmatpush.msra.mxu3 %v112_v11  ;;  %v110_v16 = vld [vmem:[%s372_s3 + $0xe0] sm:$0xff]  ;;  %v92_v19 = vld [vmem:[%s372_s3 + $0x50] sm:$0xff] }
   0x8   :  { %55 = vmatpush.msra.mxu0 %v22_v9  ;;  %75 = vmatpush.msra.mxu1 %v23_v10  ;;  %v108_v20 = vld [vmem:[%s372_s3 + $0xd0] sm:$0xff] }
   0x9   :  { %176 = vmatmul.msk.f32.vlgmr.msra.gmra.mxu0 %vm36_vm0, %v21_v12  ;;  %177 = vmatmul.msk.f32.vlgmr.msra.gmra.mxu1 %vm36_vm0, %v21_v12 }
   0xa   :  { %120 = vmatpush.msra.mxu2 %v95_v13  ;;  %140 = vmatpush.msra.mxu3 %v111_v14 }
   0xc   :  { %121 = vmatpush.msra.mxu2 %v94_v15  ;;  %141 = vmatpush.msra.mxu3 %v110_v16 }
   0xd   :  { %10 = vsyncpa [#allocation3], 0  ;;  %v91_v21 = vld [vmem:[%s372_s3 + $0x48] sm:$0xff]  ;;  %v90_v23 = vld [vmem:[%s372_s3 + $0x40] sm:$0xff]  ;;  %s167_s25 = sshll.u32 %s374_s5, 4  ;;  %vm158_vm1 = vcmask 523264   ;;  %s168_s25 = int_to_ptr.hbm [resolvable:$true] %s167_s25 }
   0xe   :  { %122 = vmatpush.msra.mxu2 %v93_v17  ;;  %142 = vmatpush.msra.mxu3 %v109_v18  ;;  %v107_v22 = vld [vmem:[%s372_s3 + $0xc8] sm:$0xff]  ;;  %v106_v24 = vld [vmem:[%s372_s3 + $0xc0] sm:$0xff]  ;;  %v89_v25 = vld [vmem:[%s372_s3 + $0x38] sm:$0xff] }
   0xf   :  { %v105_v26 = vld [vmem:[%s372_s3 + $0xb8] sm:$0xff]  ;;  %v88_v27 = vld [vmem:[%s372_s3 + $0x30] sm:$0xff]  ;;  %v87_v29 = vld [vmem:[%s372_s3 + $0x28] sm:$0xff] }
  0x10   :  { %123 = vmatpush.msra.mxu2 %v92_v19  ;;  %143 = vmatpush.msra.mxu3 %v108_v20  ;;  %v104_v28 = vld [vmem:[%s372_s3 + $0xb0] sm:$0xff]  ;;  %v103_v30 = vld [vmem:[%s372_s3 + $0xa8] sm:$0xff]  ;;  %v86_v31 = vld [vmem:[%s372_s3 + $0x20] sm:$0xff] }
  0x11   :  { %v102_v32 = vld [vmem:[%s372_s3 + $0xa0] sm:$0xff]  ;;  %v85_v33 = vld [vmem:[%s372_s3 + $0x18] sm:$0xff]  ;;  %v84_v34 = vld [vmem:[%s372_s3 + $0x10] sm:$0xff] }
  0x12   :  { %124 = vmatpush.msra.mxu2 %v91_v21  ;;  %144 = vmatpush.msra.mxu3 %v107_v22  ;;  %v101_v35 = vld [vmem:[%s372_s3 + $0x98] sm:$0xff]  ;;  %v83_v36 = vld [vmem:[%s372_s3 + $0x8] sm:$0xff]  ;;  %v100_v37 = vld [vmem:[%s372_s3 + $0x90] sm:$0xff] }
  0x13   :  { %v82_v38 = vld [vmem:[%s372_s3] sm:$0xff]  ;;  %v99_v39 = vld [vmem:[%s372_s3 + $0x88] sm:$0xff] }
  0x14   :  { %125 = vmatpush.msra.mxu2 %v90_v23  ;;  %145 = vmatpush.msra.mxu3 %v106_v24  ;;  %v98_v40 = vld [vmem:[%s372_s3 + $0x80] sm:$0xff]  ;;  %s206_s3 = smov [#allocation2]  }
  0x15   :  { %v30_v41 = vld [vmem:[%s371_s2] sm:$0x3]  ;;  %s165_s0 = sshll.u32 %s206_s3, 4  ;;  %s166_s0 = int_to_ptr.vmem [resolvable:$true] %s165_s0 }
  0x16   :  { %126 = vmatpush.msra.mxu2 %v89_v25  ;;  %146 = vmatpush.msra.mxu3 %v105_v26  ;;  %v32_v42 = vperm.slane %v30_v41, 0  ;;  %v33_v43 = vperm.slane %v30_v41, 1  ;;  %v179_v50 = vld [vmem:[%s373_s4] ss:$0 sm:$0xff] }
  0x18   :  { %127 = vmatpush.msra.mxu2 %v88_v27  ;;  %147 = vmatpush.msra.mxu3 %v104_v28 }
  0x1a   :  { %128 = vmatpush.msra.mxu2 %v87_v29  ;;  %148 = vmatpush.msra.mxu3 %v103_v30 }
  0x1c   :  { %129 = vmatpush.msra.mxu2 %v86_v31  ;;  %149 = vmatpush.msra.mxu3 %v102_v32 }
  0x1e   :  { %130 = vmatpush.msra.mxu2 %v85_v33  ;;  %150 = vmatpush.msra.mxu3 %v101_v35 }
  0x20   :  { %131 = vmatpush.msra.mxu2 %v84_v34  ;;  %151 = vmatpush.msra.mxu3 %v100_v37 }
  0x22   :  { %132 = vmatpush.msra.mxu2 %v83_v36  ;;  %152 = vmatpush.msra.mxu3 %v99_v39 }
  0x24   :  { %133 = vmatpush.msra.mxu2 %v82_v38  ;;  %153 = vmatpush.msra.mxu3 %v98_v40 }
  0x86   :  { %v57_v44 = vpop.f32.mrf.mxu0  ;;  %v77_v45 = vpop.f32.mrf.mxu1 }
  0x87   :  { %v58_v46 = vadd.f32 %v57_v44, %v32_v42  ;;  %v78_v47 = vadd.f32 %v77_v45, %v33_v43 }
  0x89   :  { %v80_v48 = vmax.f32 %v58_v46, 0.0  ;;  %v81_v49 = vmax.f32 %v78_v47, 0.0 }
  0x8b   :  { %134 = vmatmul.f32.vlgmr.msra.gmra.mxu2 %v80_v48  ;;  %154 = vmatmul.f32.vlgmr.msra.gmra.mxu3 %v81_v49 }
 0x10e   :  { %v135_v51 = vpop.f32.mrf.mxu2  ;;  %v155_v52 = vpop.f32.mrf.mxu3 }
 0x10f   :  { %v136_v53 = vadd.f32 %v179_v50, %v135_v51 }
 0x111   :  { %v156_v54 = vadd.f32 %v155_v52, %v136_v53 }
 0x113   :  { %159 = vst.msk [vmem:[#allocation2] sm:$0xff] %vm158_vm1, %v156_v54 }
 0x114   :  { %170 = dma.vmem_to_hbm [thread:$0]  %s166_s0, 128, %s168_s25, [#allocation3]  }
 0x115   :  { %204 = dma.done.wait [#allocation3], 128  }
 0x116   :  { %205 = vsyncadd [#allocation3], 4294967168 }
 0x117   :  { %175 = vsyncpa [#allocation3], 1 }

</bundles_post_ra>
